<compile_context>
chip_gen: v7x
topology: tpu7x:2x2x1
jax: 0.10.0
libtpu: 0.0.40
codegen_flags: <defaults>
</compile_context>

<pallas_src>
import functools

import jax
import jax.numpy as jnp
from jax.experimental import pallas as pl
from jax.experimental.pallas import tpu as pltpu


def forward_nll_kernel(preds_ref, trans_ref, targets_ref, out_ref, acc_ref,
                       *, n_total, tile_rows):
    i = pl.program_id(0)

    @pl.when(i == 0)
    def _init():
        acc_ref[...] = jnp.zeros_like(acc_ref)

    preds = preds_ref[...]                     # (TN, C) streamed tile
    trans = trans_ref[...]                     # (C, C) resident across the grid

    # noisy = preds @ T on the MXU, f32 accumulation.
    noisy = jnp.dot(preds, trans, preferred_element_type=jnp.float32)   # (TN, C)

    tn, c = noisy.shape
    # Gather noisy[i, targets[i]] via an iota/compare mask (no dynamic gather on
    # TPU), THEN take log of the gathered (TN, 1) vector only.
    col_ids = jax.lax.broadcasted_iota(jnp.int32, (tn, c), 1)            # (TN, C)
    mask = col_ids == targets_ref[...]                                   # (TN, 1) bcast
    picked = jnp.sum(jnp.where(mask, noisy, 0.0), axis=-1, keepdims=True)  # (TN, 1)

    # Ragged last tile: map padded rows to 1.0 so they add log(1)=0 to the sum.
    num_tiles = -(-n_total // tile_rows)
    if num_tiles * tile_rows != n_total:
        row_ids = jax.lax.broadcasted_iota(jnp.int32, (tn, 1), 0) + i * tile_rows
        picked = jnp.where(row_ids < n_total, picked, 1.0)

    acc_ref[...] += jnp.sum(jnp.log(picked), keepdims=True)              # (1, 1)

    @pl.when(i == pl.num_programs(0) - 1)
    def _finalize():
        # reduction='mean' over the TRUE batch size.
        out_ref[...] = -acc_ref[...] / jnp.float32(n_total)


def forward_nll_loss(preds, transitions, targets, *, tile_rows=512):
    """preds: (N, C) probabilities; transitions: (C, C); targets: (N,) int."""
    n, c = preds.shape
    assert transitions.shape == (c, c)
    targets_2d = targets.astype(jnp.int32).reshape(n, 1)

    # Row tile: full batch if small, otherwise 512 rows (multiple of 8; keeps
    # 2x double-buffered preds tiles + resident transitions well under the
    # v7x 32 MiB scoped VMEM for typical C).
    tn = n if n <= tile_rows else tile_rows
    grid = (pl.cdiv(n, tn),)

    kernel = functools.partial(forward_nll_kernel, n_total=n, tile_rows=tn)

    loss = pl.pallas_call(
        kernel,
        out_shape=jax.ShapeDtypeStruct((1, 1), jnp.float32),
        grid_spec=pltpu.PrefetchScalarGridSpec(
            num_scalar_prefetch=0,
            grid=grid,
            in_specs=[
                pl.BlockSpec((tn, c), lambda i: (i, 0)),        # preds (streamed)
                pl.BlockSpec((c, c), lambda i: (0, 0)),         # transitions (resident)
                pl.BlockSpec((tn, 1), lambda i: (i, 0)),        # targets (streamed)
            ],
            out_specs=pl.BlockSpec((1, 1), lambda i: (0, 0)),   # scalar loss (resident)
            scratch_shapes=[pltpu.VMEM((1, 1), jnp.float32)],   # running sum
        ),
        compiler_params=pltpu.CompilerParams(
            dimension_semantics=("arbitrary",),                 # reduction axis
        ),
    )(preds, transitions, targets_2d)
    return loss[0, 0]
    # TODO(synk): on v7x, split the batch axis across the 2 TensorCores with a
    # leading "parallel" axis and combine per-core partial sums in the wrapper.


def make_symmetric_transition_matrix(num_classes, noise=0.2, dtype=jnp.float32):
    """Deterministic estimator.transitions: (1 - noise) on diag, noise/(C-1) off-diag."""
    eye = jnp.eye(num_classes, dtype=dtype)
    off = (1.0 - eye) * (noise / (num_classes - 1))
    return eye * (1.0 - noise) + off


def _reference(preds, transitions, targets):
    noisy = preds @ transitions
    logp = jnp.log(noisy)
    return -jnp.mean(logp[jnp.arange(preds.shape[0]), targets])


if __name__ == "__main__":
    C = 32
    key = jax.random.PRNGKey(0)

    # --- case 1: small batch (single tile) ---
    N1 = 8
    k1, k2, k3, k4 = jax.random.split(key, 4)
    preds1 = jax.nn.softmax(jax.random.normal(k1, (N1, C), dtype=jnp.float32), axis=-1)
    targets1 = jax.random.randint(k2, (N1,), 0, C, dtype=jnp.int32)
    transitions = make_symmetric_transition_matrix(C, noise=0.2)

    loss1 = jax.block_until_ready(forward_nll_loss(preds1, transitions, targets1))
    ref1 = _reference(preds1, transitions, targets1)
    assert jnp.allclose(loss1, ref1, rtol=1e-5, atol=1e-5), (loss1, ref1)

    # --- case 2: batch larger than one tile + ragged last tile (600 = 512 + 88) ---
    N2 = 600
    preds2 = jax.nn.softmax(jax.random.normal(k3, (N2, C), dtype=jnp.float32), axis=-1)
    targets2 = jax.random.randint(k4, (N2,), 0, C, dtype=jnp.int32)

    loss2 = jax.block_until_ready(forward_nll_loss(preds2, transitions, targets2))
    ref2 = _reference(preds2, transitions, targets2)
    assert jnp.allclose(loss2, ref2, rtol=1e-5, atol=1e-5), (loss2, ref2)

    print("KERNEL_OK")
</pallas_src>

<mosaic_0001>
module attributes {stable_mosaic.version = 11 : i64} {
  func.func @forward_nll_kernel(%arg0: i32, %arg1: memref<8x32xf32, #tpu.memory_space<vmem>>, %arg2: memref<32x32xf32, #tpu.memory_space<vmem>>, %arg3: memref<8x1xi32, #tpu.memory_space<vmem>>, %arg4: memref<1x1xf32, #tpu.memory_space<vmem>>, %arg5: memref<1x1xf32, #tpu.memory_space<vmem>>) attributes {dimension_semantics = [#tpu.dimension_semantics<arbitrary>], iteration_bounds = array<i64: 1>, scalar_prefetch = 0 : i64, scratch_operands = 1 : i64, tpu.core_type = #tpu.core_type<tc>, window_params = [{transform_indices = @transform_0, window_bounds = array<i64: 8, 32>}, {pipeline_mode = #tpu.pipeline_mode<synchronous>, transform_indices = @transform_1, window_bounds = array<i64: 32, 32>}, {transform_indices = @transform_2, window_bounds = array<i64: 8, 1>}, {pipeline_mode = #tpu.pipeline_mode<synchronous>, transform_indices = @transform_3, window_bounds = array<i64: 1, 1>}]} {
    %c0_i32 = arith.constant 0 : i32
    %0 = arith.cmpi eq, %arg0, %c0_i32 : i32
    %1 = arith.extui %0 : i1 to i32
    %c0_i32_0 = arith.constant 0 : i32
    %2 = arith.cmpi ne, %1, %c0_i32_0 : i32
    scf.if %2 {
      %cst_15 = arith.constant 0.000000e+00 : f32
      %26 = vector.broadcast %cst_15 : f32 to vector<1x1xf32>
      %c0_16 = arith.constant 0 : index
      %c0_17 = arith.constant 0 : index
      %27 = vector.load %arg5[%c0_16, %c0_17] : memref<1x1xf32, #tpu.memory_space<vmem>>, vector<1x1xf32>
      tpu.vector_store %arg5[%c0_16, %c0_17], %26 {strides = array<i32>} : memref<1x1xf32, #tpu.memory_space<vmem>>, vector<1x1xf32>,
    } else {
    }
    %c0 = arith.constant 0 : index
    %c0_1 = arith.constant 0 : index
    %3 = vector.load %arg1[%c0, %c0_1] : memref<8x32xf32, #tpu.memory_space<vmem>>, vector<8x32xf32>
    %c0_2 = arith.constant 0 : index
    %c0_3 = arith.constant 0 : index
    %4 = vector.load %arg2[%c0_2, %c0_3] : memref<32x32xf32, #tpu.memory_space<vmem>>, vector<32x32xf32>
    %cst = arith.constant dense<0.000000e+00> : vector<8x32xf32>
    %5 = tpu.matmul %3, %4, %cst {dimension_numbers = #tpu.dot_dimension_numbers<[1], [0], [0], [1], [0, 0, 1, 1], [], []>} : vector<8x32xf32>, vector<32x32xf32>, vector<8x32xf32> -> vector<8x32xf32>
    %6 = tpu.iota {dimensions = array<i32: 1>} : vector<8x32xi32>
    %c0_4 = arith.constant 0 : index
    %c0_5 = arith.constant 0 : index
    %7 = vector.load %arg3[%c0_4, %c0_5] : memref<8x1xi32, #tpu.memory_space<vmem>>, vector<8x1xi32>
    %8 = vector.broadcast %7 : vector<8x1xi32> to vector<8x32xi32>
    %9 = arith.cmpi eq, %6, %8 : vector<8x32xi32>
    %cst_6 = arith.constant 0.000000e+00 : f32
    %10 = vector.broadcast %cst_6 : f32 to vector<8x32xf32>
    %11 = arith.select %9, %5, %10 : vector<8x32xi1>, vector<8x32xf32>
    %cst_7 = arith.constant dense<0.000000e+00> : vector<8xf32>
    %12 = vector.multi_reduction <add>, %11, %cst_7 [1] : vector<8x32xf32> to vector<8xf32>
    %13 = vector.shape_cast %12 : vector<8xf32> to vector<8x1xf32>
    %c0_8 = arith.constant 0 : index
    %c0_9 = arith.constant 0 : index
    %14 = vector.load %arg5[%c0_8, %c0_9] : memref<1x1xf32, #tpu.memory_space<vmem>>, vector<1x1xf32>
    %15 = math.log %13 : vector<8x1xf32>
    %16 = vector.shape_cast %15 : vector<8x1xf32> to vector<1x8x1xf32>
    %cst_10 = arith.constant dense<0.000000e+00> : vector<1xf32>
    %17 = vector.multi_reduction <add>, %16, %cst_10 [1, 2] : vector<1x8x1xf32> to vector<1xf32>
    %18 = vector.shape_cast %17 : vector<1xf32> to vector<1x1x1xf32>
    %19 = vector.extract %18[0, 0, 0] : f32 from vector<1x1x1xf32>
    %20 = vector.broadcast %19 : f32 to vector<1x1xf32>
    %21 = arith.addf %14, %20 : vector<1x1xf32>
    %c0_11 = arith.constant 0 : index
    %c0_12 = arith.constant 0 : index
    %22 = vector.load %arg5[%c0_11, %c0_12] : memref<1x1xf32, #tpu.memory_space<vmem>>, vector<1x1xf32>
    tpu.vector_store %arg5[%c0_11, %c0_12], %21 {strides = array<i32>} : memref<1x1xf32, #tpu.memory_space<vmem>>, vector<1x1xf32>,
    %c0_i32_13 = arith.constant 0 : i32
    %23 = arith.cmpi eq, %arg0, %c0_i32_13 : i32
    %24 = arith.extui %23 : i1 to i32
    %c0_i32_14 = arith.constant 0 : i32
    %25 = arith.cmpi ne, %24, %c0_i32_14 : i32
    scf.if %25 {
      %c0_15 = arith.constant 0 : index
      %c0_16 = arith.constant 0 : index
      %26 = vector.load %arg5[%c0_15, %c0_16] : memref<1x1xf32, #tpu.memory_space<vmem>>, vector<1x1xf32>
      %cst_17 = arith.constant 0.000000e+00 : f32
      %27 = vector.broadcast %cst_17 : f32 to vector<1x1xf32>
      %28 = arith.subf %27, %26 : vector<1x1xf32>
      %cst_18 = arith.constant 8.000000e+00 : f32
      %29 = vector.broadcast %cst_18 : f32 to vector<1x1xf32>
      %30 = arith.divf %28, %29 : vector<1x1xf32>
      %c0_19 = arith.constant 0 : index
      %c0_20 = arith.constant 0 : index
      %31 = vector.load %arg4[%c0_19, %c0_20] : memref<1x1xf32, #tpu.memory_space<vmem>>, vector<1x1xf32>
      tpu.vector_store %arg4[%c0_19, %c0_20], %30 {strides = array<i32>} : memref<1x1xf32, #tpu.memory_space<vmem>>, vector<1x1xf32>,
    } else {
    }
    return
  }
  func.func @transform_0(%arg0: i32) -> (i32, i32) {
    %c0_i32 = arith.constant 0 : i32
    %c0_i32_0 = arith.constant 0 : i32
    return %arg0, %c0_i32 : i32, i32
  }
  func.func @transform_1(%arg0: i32) -> (i32, i32) {
    %c0_i32 = arith.constant 0 : i32
    %c0_i32_0 = arith.constant 0 : i32
    %c0_i32_1 = arith.constant 0 : i32
    return %c0_i32, %c0_i32_0 : i32, i32
  }
  func.func @transform_2(%arg0: i32) -> (i32, i32) {
    %c0_i32 = arith.constant 0 : i32
    %c0_i32_0 = arith.constant 0 : i32
    return %arg0, %c0_i32 : i32, i32
  }
  func.func @transform_3(%arg0: i32) -> (i32, i32) {
    %c0_i32 = arith.constant 0 : i32
    %c0_i32_0 = arith.constant 0 : i32
    %c0_i32_1 = arith.constant 0 : i32
    return %c0_i32, %c0_i32_0 : i32, i32
  }
}

</mosaic_0001>

<bundles_post_ra>
// kernel: tpu_custom_call.1
= control target key start
LH: loop header
LB: loop body
LE: loop exit
PB: predicated region body
PF: predicated region fallthrough
CT: control target
= control target key end

     0   :  { %8 = vsyncpa [#allocation4], 0  ;;  %s311_s0 = inlined_call_operand.vmem [shape: f32[8,32], index: 0, kind: input, shape index: {}]   ;;  %s312_s1 = inlined_call_operand.hbm [shape: f32[32,32], index: 1, kind: input, shape index: {}]   ;;  %s313_s2 = inlined_call_operand.vmem [shape: s32[8,1], index: 2, kind: input, shape index: {}]   ;;  %s314_s3 = inlined_call_operand.hbm [shape: f32[1,1], index: 3, kind: output, shape index: {}]  }
   0x1   :  { %9 = vsyncpa [#allocation5], 0  ;;  %s250_s12 = smov [#allocation3]   ;;  %s202_s16 = scalar_lea.hbm %s312_s1, 512 }
   0x2   :  { %s17_s13 = sshll.u32 %s250_s12, 4  ;;  %p203_p0 = scmp.ne.s32.totalorder %s312_s1, %s202_s16  ;;  %s18_s13 = int_to_ptr.vmem [resolvable:$true] %s17_s13 }
   0x3   :  { %p206_p1 = scmp.lt.u32.totalorder %s202_s16, %s312_s1 }
   0x5   :  { %p208_p2 = pnand %p206_p1, %p203_p0 }
   0x7   :  { %211 = shalt.err (!%p208_p2)
}
   0x8   :  { %s212_s21 = scalar_lea.vmem %s18_s13, 512  ;;  %p217_p4 = scmp.lt.s32.totalorder %s18_s13, %s18_s13 }
   0x9   :  { %p213_p3 = scmp.ne.s32.totalorder %s18_s13, %s212_s21  ;;  %p218_p5 = scmp.lt.s32.totalorder %s212_s21, %s212_s21 }
   0xb   :  { %p219_p6 = por %p218_p5, %p217_p4 }
   0xd   :  { %p220_p7 = pnand %p219_p6, %p213_p3 }
   0xf   :  { %223 = shalt.err (!%p220_p7)
}
  0x10   :  { %s251_s22 = smov 128   ;;  %s252_s23 = smov 8  }
  0x11   :  { %23 = dma.hbm_to_vmem [thread:$0]  %s312_s1, 512, %s18_s13, [#allocation4], %s251_s22, %s251_s22, %s252_s23  }
  0x12   :  { %246 = dma.done.wait [#allocation4], 512  }
  0x13   :  { %247 = vsyncadd [#allocation4], 4294966784  ;;  %vm33_vm0 = vcmask 0   ;;  %v253_v0 = vmov 0.0|0.0   ;;  %v254_v1 = vmov 0.0   ;;  %vm255_vm1 = vmmov 0  }
  0x14   :  { %183 = vmatprep.subr.bf16.mxu0 %v253_v0  ;;  %34 = vst.msk [vmem:[#allocation2] sm:$0x1] %vm33_vm0, %v254_v1  ;;  %180 = vmatprep.mubr.msk.f32.mxu0 %vm255_vm1, %v254_v1  ;;  %v256_v2 = vmov 0   ;;  %v36_v3 = vld [vmem:[#allocation3] sm:$0xff]  ;;  %v37_v4 = vld [vmem:[#allocation3 + $0x8] sm:$0xff]  ;;  %v38_v5 = vld [vmem:[#allocation3 + $0x10] sm:$0xff]  ;;  %v114_v11 = vlaneseq }
  0x15   :  { %199 = vset.pattern.permute.xlu0 %v256_v2  ;;  %v184_v6 = vpack.c.bf16 %v37_v4, %v36_v3  ;;  %v39_v7 = vld [vmem:[#allocation3 + $0x18] sm:$0xff]  ;;  %vm40_vm2 = vcmask 261120   ;;  %vm128_vm4 = vcmask 7168  }
  0x16   :  { %v116_v8 = vld [vmem:[%s313_s2] sm:$0xff]  ;;  %v187_v9 = vpack.c.bf16 %v39_v7, %v38_v5  ;;  %v115_v12 = vand.u32 127, %v114_v11  ;;  %s257_s2 = smov [#allocation6]  }
  0x17   :  { %118 = vperm.xlu0 %199, %v116_v8   ;;  %185 = vmatpush3.bf16.msra.mxu0 %v184_v6  ;;  %v35_v10 = vld [vmem:[%s311_s0] sm:$0xff]  ;;  %s157_s29 = sshll.u32 %s257_s2, 4  ;;  %s158_s29 = int_to_ptr.vmem [resolvable:$true] %s157_s29 }
  0x18   :  { %186 = vmatprep.subr.bf16.mxu0 %v253_v0  ;;  %s224_s30 = scalar_lea.vmem %s158_s29, 16  ;;  %s228_s4 = scalar_lea.vmem %s158_s29, 32 }
  0x19   :  { %p225_p8 = scmp.ne.s32.totalorder %s158_s29, %s224_s30  ;;  %p229_p9 = scmp.lt.s32.totalorder %s158_s29, %s158_s29 }
  0x1a   :  { %p230_p10 = scmp.lt.s32.totalorder %s228_s4, %s224_s30 }
  0x1b   :  { %188 = vmatpush3.bf16.msra.mxu0 %v187_v9  ;;  %v125_v29 = vld [vmem:[#allocation2] sm:$0x1] }
  0x1c   :  { %p231_p11 = por %p230_p10, %p229_p9 }
  0x1e   :  { %181 = vmatmul.mubr.msk.f32.vlgmr.msra.gmra.mrb[0].mxu0 %vm40_vm2, %v35_v10  ;;  %p232_p12 = pnand %p231_p11, %p225_p8 }
  0x96   :  { %v119_v13 = vpop.permute.xlu0 %118 }
  0x97   :  { %vm120_vm3 = vcmp.eq.s32.totalorder %v115_v12, %v119_v13 }
  0xf1   :  { %v110_v14 = vpop.f32.mrb[0].mxu0 }
  0xf2   :  { %v121_v15 = vsel %vm120_vm3, %v110_v14, 0.0  ;;  %v182_v16 = vpop.f32.mrb[1].mxu0 }
  0xf3   :  { %v122_v17 = vsel %vm40_vm2, %v121_v15, 0.0 }
  0xf4   :  { %123 = vadd.xlane.f32.xlu0 %v122_v17 }
 0x181   :  { %v124_v18 = vpop.xlane.xlu0 %123 }
 0x182   :  { %200 = vlog2.f32 %v124_v18 }
 0x18c   :  { %v201_v19 = vpop.eup %200 }
 0x18d   :  { %v127_v20 = vmul.f32 0.6931472, %v201_v19 }
 0x18f   :  { %v129_v21 = vsel %vm128_vm4, %v127_v20, 0.0 }
 0x190   :  { %130 = vadd.xlane.f32.xlu1 %v129_v21 }
 0x21d   :  { %v131_v22 = vpop.xlane.xlu1 %130 }
 0x21e   :  { %v132_v23 = vrot.slane %v131_v22, 4 }
 0x220   :  { %v133_v24 = vadd.f32 %v132_v23, %v131_v22 }
 0x222   :  { %v134_v25 = vrot.slane %v133_v24, 2 }
 0x224   :  { %v135_v26 = vadd.f32 %v134_v25, %v133_v24 }
 0x226   :  { %v136_v27 = vrot.slane %v135_v26, 1 }
 0x228   :  { %v137_v28 = vadd.f32 %v136_v27, %v135_v26 }
 0x22a   :  { %189 = vpush %v137_v28 }
 0x25b   :  { %s190_s0 = spop %189 }
 0x25c   :  { %v139_v30 = vstv %s190_s0 }
 0x25d   :  { %v140_v31 = vadd.f32 %v139_v30, %v125_v29 }
 0x25f   :  { %142 = vst.msk [vmem:[#allocation2] sm:$0x1] %vm33_vm0, %v140_v31 }
 0x266   :  { %v146_v32 = vld [vmem:[#allocation2] sm:$0x1] }
 0x267   :  { %v147_v33 = vsub.f32 0.0, %v146_v32 }
 0x269   :  { %v149_v34 = vmul.f32 0.125, %v147_v33 }
 0x26b   :  { %150 = vst.msk [vmem:[#allocation6] sm:$0x1] %vm33_vm0, %v149_v34 }
 0x26c   :  { %235 = shalt.err (!%p232_p12)
}
 0x26d   :  { %s236_s7 = scalar_lea.hbm %s314_s3, 16 }
 0x26e   :  { %p237_p13 = scmp.ne.s32.totalorder %s314_s3, %s236_s7  ;;  %p240_p0 = scmp.lt.u32.totalorder %s236_s7, %s314_s3 }
 0x270   :  { %p242_p1 = pnand %p240_p0, %p237_p13 }
 0x272   :  { %245 = shalt.err (!%p242_p1)
}
 0x273   :  { %160 = dma.vmem_to_hbm [thread:$0]  %s158_s29, 16, %s314_s3, [#allocation5]  }
 0x274   :  { %248 = dma.done.wait [#allocation5], 16  }
 0x275   :  { %249 = vsyncadd [#allocation5], 4294967280 }
 0x276   :  { %164 = vsyncpa [#allocation4], 1 }
 0x277   :  { %165 = vsyncpa [#allocation5], 1 }

</bundles_post_ra>
